<compile_context>
chip_gen: v7x
topology: tpu7x:2x2x1
jax: 0.10.0
libtpu: 0.0.40
codegen_flags: <defaults>
</compile_context>

<pallas_src>
import functools

import jax
import jax.numpy as jnp
from jax.experimental import pallas as pl
from jax.experimental.pallas import tpu as pltpu


_VMEM_LIMIT_BYTES = 48 * 1024 * 1024   # explicit scoped-VMEM limit (safe on v7x's 64 MiB)
_VMEM_BUDGET_BYTES = 32 * 1024 * 1024  # working-set target used to pick the strip height


# ---------------------------------------------------------------------------
# Banded weight construction (wrapper side, plain XLA).
# ---------------------------------------------------------------------------
def _banded_weights(w_hwio, in_cols, out_cols, out_col_mask=None):
    """3x3 HWIO conv weights -> 3 banded matmul matrices (one per kh).

    Returns M of shape (3, in_cols*Cin, out_cols*Cout) with
      M[kh, (o + kw)*Cin + ci, o*Cout + co] = w[kh, kw, ci, co]
    so a lane-dense input row (in_cols*Cin lanes) @ M[kh] produces the lane-
    dense output row (out_cols*Cout lanes) for that kh tap.  Columns where
    out_col_mask is 0 are left entirely zero (used to bake conv2's zero 'same'
    padding into conv1's halo columns).
    """
    ci, co = w_hwio.shape[2], w_hwio.shape[3]
    i_idx = jnp.arange(in_cols)[None, :, None]
    o_idx = jnp.arange(out_cols)[None, None, :]
    k_idx = jnp.arange(3)[:, None, None]
    placement = (i_idx == o_idx + k_idx).astype(w_hwio.dtype)      # (3, in, out)
    if out_col_mask is not None:
        placement = placement * out_col_mask.astype(w_hwio.dtype)[None, None, :]
    m = jnp.einsum("kio,hkab->hiaob", placement, w_hwio)           # (3, in, Ci, out, Co)
    return m.reshape(3, in_cols * ci, out_cols * co)


# ---------------------------------------------------------------------------
# Fused kernel: relu(conv2(relu(conv1(x)))) for one (batch, row-strip) step.
# ---------------------------------------------------------------------------
def _fused_conv_block_kernel(x_ref, m1_ref, b1_ref, m2_ref, b2_ref, o_ref,
                             *scratch, use_dma, prefetch):
    """
    x_ref : use_dma=False -> VMEM block (1, TH+4, (W+4)*Cin), auto-pipelined.
            use_dma=True  -> HBM ref (N, H+4, (W+4)*Cin), manually DMA'd.
    m1_ref: (3, (W+4)*Cin, (W+2)*Cout)   conv1 banded matrices (per kh)
    b1_ref: (1, (W+2)*Cout)              conv1 bias row (zero on halo columns)
    m2_ref: (3, (W+2)*Cout, W*Cout)      conv2 banded matrices (per kh)
    b2_ref: (1, W*Cout)                  conv2 bias row
    o_ref : (1, TH, W*Cout)              lane-dense output strip
    """
    TH = o_ref.shape[1]
    R1 = TH + 2                              # rows of the conv1 intermediate
    s = pl.program_id(1)
    n_strips = pl.num_programs(1)

    if use_dma:
        x_vmem, h_vmem, copy_sem = scratch
        n = pl.program_id(0)

        def strip_copy(strip, slot):
            return pltpu.make_async_copy(
                x_ref.at[n, pl.ds(strip * TH, TH + 4)],
                x_vmem.at[slot],
                copy_sem.at[slot])

        if prefetch:
            # Double-buffered halo-strip DMA (strip axis is sequential within a
            # batch): wait on the strip prefetched by the previous step and
            # issue the NEXT strip's fetch before computing, so the HBM latency
            # is hidden for every strip but the first of each batch.
            slot = s & 1

            @pl.when(s == 0)
            def _():                          # prime the pipeline for this batch
                strip_copy(s, slot).start()

            strip_copy(s, slot).wait()

            @pl.when(s + 1 < n_strips)
            def _():                          # overlap next fetch with this compute
                strip_copy(s + 1, 1 - slot).start()
        else:
            # Strips are grid-parallel (N == 1 path feeding both v7x cores);
            # cross-step prefetch is not megacore-safe, so fetch our own strip.
            slot = 0
            strip_copy(s, 0).start()
            strip_copy(s, 0).wait()

        xs = x_vmem[slot]                     # (TH+4, (W+4)*Cin)
    else:
        (h_vmem,) = scratch
        xs = x_ref[0]                         # (TH+4, (W+4)*Cin), auto-pipelined

    # ---- conv1 + bias + ReLU (banded matmuls, f32 accumulation) -----------
    acc1 = jnp.dot(xs[0:R1, :], m1_ref[0], preferred_element_type=jnp.float32)
    acc1 = acc1 + jnp.dot(xs[1:R1 + 1, :], m1_ref[1], preferred_element_type=jnp.float32)
    acc1 = acc1 + jnp.dot(xs[2:R1 + 2, :], m1_ref[2], preferred_element_type=jnp.float32)
    h_vmem[...] = jnp.maximum(acc1 + b1_ref[...], 0.0)

    # conv2's 'same' padding must be zeros.  Halo COLUMNS are already zero
    # (baked into m1/b1_row); zero the top/bottom halo ROW only on the strips
    # touching the image boundary.
    zero_row = jnp.zeros((h_vmem.shape[1],), h_vmem.dtype)

    @pl.when(s == 0)
    def _():
        h_vmem[0, :] = zero_row

    @pl.when(s == n_strips - 1)
    def _():
        h_vmem[R1 - 1, :] = zero_row

    # ---- conv2 + bias + ReLU ----------------------------------------------
    hs = h_vmem[...]
    acc2 = jnp.dot(hs[0:TH, :], m2_ref[0], preferred_element_type=jnp.float32)
    acc2 = acc2 + jnp.dot(hs[1:TH + 1, :], m2_ref[1], preferred_element_type=jnp.float32)
    acc2 = acc2 + jnp.dot(hs[2:TH + 2, :], m2_ref[2], preferred_element_type=jnp.float32)
    y = jnp.maximum(acc2 + b2_ref[...], 0.0)

    # Lane-dense store: last dim W*Cout (full-width vst, no masking).
    o_ref[...] = y.reshape(1, TH, y.shape[-1]).astype(o_ref.dtype)


# ---------------------------------------------------------------------------
# Strip-height selection.
# ---------------------------------------------------------------------------
def _vmem_working_set_bytes(th, W, Cin, Cout):
    """Rough f32 working-set estimate for one grid step (double buffers incl.)."""
    wp1 = (W + 4) * Cin
    wh = (W + 2) * Cout
    wo = W * Cout
    x_buf = 2 * (th + 4) * wp1                          # manual input double buffer
    h_buf = (th + 2) * wh                               # conv1 intermediate
    consts = 2 * (3 * wp1 * wh + 3 * wh * wo + wh + wo)  # pipelined const operands
    out_buf = 2 * th * wo                               # pipelined output block
    temps = 4 * (th + 2) * (wh + wo)                    # matmul / relayout headroom
    return 4 * (x_buf + h_buf + consts + out_buf + temps)


def _choose_strip_rows(N, H, W, Cin, Cout):
    """Largest strip height (H itself, or a multiple of 8 dividing H) whose
    working set fits the VMEM budget.  For N == 1, prefer >= 2 strips so both
    v7x TensorCores get work (v5e/v6e have one core and just loop)."""
    cands = [H] + [t for t in range(8 * (H // 8), 0, -8) if H % t == 0 and t != H]
    if N == 1:
        split = [t for t in cands if t <= H // 2]
        if split:
            cands = split
    for t in cands:
        if _vmem_working_set_bytes(t, W, Cin, Cout) <= _VMEM_BUDGET_BYTES:
            return t
    return cands[-1]


# ---------------------------------------------------------------------------
# Wrapper.
# ---------------------------------------------------------------------------
def conv_block_nhwc(x_nhwc, w1, b1, w2, b2, *, strip_rows=None):
    """Fused ConvBlock over NHWC input via one pallas_call, grid=(N, row strips)."""
    N, H, W, Cin = x_nhwc.shape
    Cout = w1.shape[-1]

    TH = _choose_strip_rows(N, H, W, Cin, Cout) if strip_rows is None else strip_rows
    assert H % TH == 0 and (TH == H or TH % 8 == 0), (H, TH)
    n_strips = H // TH

    use_dma = n_strips > 1                       # strips overlap by a 4-row halo
    strip_parallel = (N == 1 and n_strips > 1)   # feed both v7x cores when N == 1
    prefetch = not strip_parallel

    # Lane-dense HBM layout: one zero-pad of 2 covers both convs' 'same' pads;
    # W and C flattened into the lane axis -> contiguous DMAs / full-width vst.
    x_pad = jnp.pad(x_nhwc, ((0, 0), (2, 2), (2, 2), (0, 0)))
    x_pad = x_pad.reshape(N, H + 4, (W + 4) * Cin)

    # Banded conv weights (one matrix per kh).  The conv1 halo columns (conv2's
    # 'same' padding) are baked to zero via the column mask + zeroed bias.
    col1 = jnp.arange(W + 2)
    interior1 = (col1 >= 1) & (col1 <= W)
    m1 = _banded_weights(w1, W + 4, W + 2, out_col_mask=interior1)
    m2 = _banded_weights(w2, W + 2, W)
    b1_row = (interior1.astype(b1.dtype)[:, None] * b1[None, :]).reshape(1, (W + 2) * Cout)
    b2_row = jnp.broadcast_to(b2, (W, Cout)).reshape(1, W * Cout)

    if use_dma:
        x_spec = pl.BlockSpec(memory_space=pl.ANY)          # stays in HBM, manual DMA
        scratch = [
            pltpu.VMEM((2, TH + 4, (W + 4) * Cin), x_nhwc.dtype),   # input double buffer
            pltpu.VMEM((TH + 2, (W + 2) * Cout), jnp.float32),      # conv1 intermediate
            pltpu.SemaphoreType.DMA((2,)),
        ]
    else:
        # No halo overlap across grid steps -> plain BlockSpec block; Pallas
        # auto-double-buffers the fetch across batches.
        x_spec = pl.BlockSpec((1, H + 4, (W + 4) * Cin), lambda n, s: (n, 0, 0))
        scratch = [pltpu.VMEM((TH + 2, (W + 2) * Cout), jnp.float32)]

    kernel = functools.partial(_fused_conv_block_kernel,
                               use_dma=use_dma, prefetch=prefetch)

    out_flat = pl.pallas_call(
        kernel,
        out_shape=jax.ShapeDtypeStruct((N, H, W * Cout), x_nhwc.dtype),
        grid=(N, n_strips),
        in_specs=[
            x_spec,
            # Constant operands: full-array blocks, constant index_map.
            pl.BlockSpec((3, (W + 4) * Cin, (W + 2) * Cout), lambda n, s: (0, 0, 0)),
            pl.BlockSpec((1, (W + 2) * Cout), lambda n, s: (0, 0)),
            pl.BlockSpec((3, (W + 2) * Cout, W * Cout), lambda n, s: (0, 0, 0)),
            pl.BlockSpec((1, W * Cout), lambda n, s: (0, 0)),
        ],
        out_specs=pl.BlockSpec((1, TH, W * Cout), lambda n, s: (n, s, 0)),
        scratch_shapes=scratch,
        compiler_params=pltpu.CompilerParams(
            dimension_semantics=("parallel",
                                 "parallel" if strip_parallel else "arbitrary"),
            vmem_limit_bytes=_VMEM_LIMIT_BYTES),
    )(x_pad, m1, b1_row, m2, b2_row)

    # Metadata-only reshape back to NHWC (same row-major layout).
    return out_flat.reshape(N, H, W, Cout)


def init_conv_block_params(key, in_features, out_features):
    """Deterministic params mimicking nn.Conv2d defaults (uniform, bound=1/sqrt(fan_in))."""
    k1, k2, k3, k4 = jax.random.split(key, 4)
    fan1 = in_features * 9
    fan2 = out_features * 9
    b1_bound = 1.0 / jnp.sqrt(fan1)
    b2_bound = 1.0 / jnp.sqrt(fan2)
    # Weights stored HWIO (3, 3, Cin, Cout).
    w1 = jax.random.uniform(k1, (3, 3, in_features, out_features),
                            jnp.float32, -b1_bound, b1_bound)
    b1 = jax.random.uniform(k2, (out_features,), jnp.float32, -b1_bound, b1_bound)
    w2 = jax.random.uniform(k3, (3, 3, out_features, out_features),
                            jnp.float32, -b2_bound, b2_bound)
    b2 = jax.random.uniform(k4, (out_features,), jnp.float32, -b2_bound, b2_bound)
    return {"w1": w1, "b1": b1, "w2": w2, "b2": b2}


@functools.partial(jax.jit, static_argnames=("strip_rows",))
def conv_block_forward(x_nchw, params, strip_rows=None):
    """ConvBlock.forward: relu(conv2(relu(conv1(x)))). NCHW in/out like PyTorch."""
    x = jnp.transpose(x_nchw, (0, 2, 3, 1))          # NCHW -> NHWC
    y = conv_block_nhwc(x, params["w1"], params["b1"], params["w2"], params["b2"],
                        strip_rows=strip_rows)
    return jnp.transpose(y, (0, 3, 1, 2))            # NHWC -> NCHW


def _reference_forward(x_nchw, params):
    """Pure-JAX reference (lax conv) for correctness checking."""
    dn = ("NCHW", "HWIO", "NCHW")
    y = jax.lax.conv_general_dilated(x_nchw, params["w1"], (1, 1), "SAME",
                                     dimension_numbers=dn)
    y = jax.nn.relu(y + params["b1"][None, :, None, None])
    y = jax.lax.conv_general_dilated(y, params["w2"], (1, 1), "SAME",
                                     dimension_numbers=dn)
    y = jax.nn.relu(y + params["b2"][None, :, None, None])
    return y


if __name__ == "__main__":
    key = jax.random.PRNGKey(0)
    k_x, k_p = jax.random.split(key)

    # Primary config (module's small test shapes): full-image path, TH = H.
    N, C_in, H, W = 2, 4, 16, 16
    C_out = 8
    x = jax.random.normal(k_x, (N, C_in, H, W), dtype=jnp.float32)
    params = init_conv_block_params(k_p, C_in, C_out)

    out = jax.block_until_ready(conv_block_forward(x, params))
    ref = _reference_forward(x, params)
    assert out.shape == (N, C_out, H, W), out.shape
    assert jnp.allclose(out, ref, atol=1e-4, rtol=1e-4), "mismatch (full-image path)"

    # Also exercise the row-strip / manual-DMA paths:
    #  (N=1, H=32)           -> parallel strips, per-step fetch
    #  (N=2, H=32, strips=8) -> sequential strips with double-buffered prefetch
    for (n2, h2, sr) in ((1, 32, None), (2, 32, 8)):
        kx2, kp2 = jax.random.split(jax.random.PRNGKey(n2 + h2))
        x2 = jax.random.normal(kx2, (n2, C_in, h2, W), dtype=jnp.float32)
        p2 = init_conv_block_params(kp2, C_in, C_out)
        o2 = jax.block_until_ready(conv_block_forward(x2, p2, strip_rows=sr))
        r2 = _reference_forward(x2, p2)
        assert o2.shape == (n2, C_out, h2, W), o2.shape
        assert jnp.allclose(o2, r2, atol=1e-4, rtol=1e-4), \
            f"mismatch (N={n2}, H={h2}, strip_rows={sr})"

    print("KERNEL_OK")
</pallas_src>

<mosaic_0001>
module attributes {stable_mosaic.version = 11 : i64} {
  func.func @_fused_conv_block_kernel(%arg0: i32, %arg1: i32, %arg2: memref<1x20x80xf32, #tpu.memory_space<vmem>>, %arg3: memref<3x80x144xf32, #tpu.memory_space<vmem>>, %arg4: memref<1x144xf32, #tpu.memory_space<vmem>>, %arg5: memref<3x144x128xf32, #tpu.memory_space<vmem>>, %arg6: memref<1x128xf32, #tpu.memory_space<vmem>>, %arg7: memref<1x16x128xf32, #tpu.memory_space<vmem>>, %arg8: memref<18x144xf32, #tpu.memory_space<vmem>>) attributes {dimension_semantics = [#tpu.dimension_semantics<parallel>, #tpu.dimension_semantics<arbitrary>], iteration_bounds = array<i64: 2, 1>, scalar_prefetch = 0 : i64, scratch_operands = 1 : i64, tpu.core_type = #tpu.core_type<tc>, window_params = [{transform_indices = @transform_0, window_bounds = array<i64: 1, 20, 80>}, {pipeline_mode = #tpu.pipeline_mode<synchronous>, transform_indices = @transform_1, window_bounds = array<i64: 3, 80, 144>}, {pipeline_mode = #tpu.pipeline_mode<synchronous>, transform_indices = @transform_2, window_bounds = array<i64: 1, 144>}, {pipeline_mode = #tpu.pipeline_mode<synchronous>, transform_indices = @transform_3, window_bounds = array<i64: 3, 144, 128>}, {pipeline_mode = #tpu.pipeline_mode<synchronous>, transform_indices = @transform_4, window_bounds = array<i64: 1, 128>}, {transform_indices = @transform_5, window_bounds = array<i64: 1, 16, 128>}]} {
    %c0 = arith.constant 0 : index
    %c0_0 = arith.constant 0 : index
    %c0_1 = arith.constant 0 : index
    %0 = vector.load %arg2[%c0, %c0_0, %c0_1] : memref<1x20x80xf32, #tpu.memory_space<vmem>>, vector<1x20x80xf32>
    %1 = vector.shape_cast %0 : vector<1x20x80xf32> to vector<20x80xf32>
    %2 = vector.extract_strided_slice %1 {offsets = [0, 0], sizes = [18, 80], strides = [1, 1]} : vector<20x80xf32> to vector<18x80xf32>
    %c0_2 = arith.constant 0 : index
    %c0_3 = arith.constant 0 : index
    %c0_4 = arith.constant 0 : index
    %3 = vector.load %arg3[%c0_2, %c0_3, %c0_4] : memref<3x80x144xf32, #tpu.memory_space<vmem>>, vector<1x80x144xf32>
    %4 = vector.shape_cast %3 : vector<1x80x144xf32> to vector<80x144xf32>
    %cst = arith.constant dense<0.000000e+00> : vector<18x144xf32>
    %5 = tpu.matmul %2, %4, %cst {dimension_numbers = #tpu.dot_dimension_numbers<[1], [0], [0], [1], [0, 0, 1, 1], [], []>} : vector<18x80xf32>, vector<80x144xf32>, vector<18x144xf32> -> vector<18x144xf32>
    %6 = vector.extract_strided_slice %1 {offsets = [1, 0], sizes = [18, 80], strides = [1, 1]} : vector<20x80xf32> to vector<18x80xf32>
    %c1 = arith.constant 1 : index
    %c0_5 = arith.constant 0 : index
    %c0_6 = arith.constant 0 : index
    %7 = vector.load %arg3[%c1, %c0_5, %c0_6] : memref<3x80x144xf32, #tpu.memory_space<vmem>>, vector<1x80x144xf32>
    %8 = vector.shape_cast %7 : vector<1x80x144xf32> to vector<80x144xf32>
    %cst_7 = arith.constant dense<0.000000e+00> : vector<18x144xf32>
    %9 = tpu.matmul %6, %8, %cst_7 {dimension_numbers = #tpu.dot_dimension_numbers<[1], [0], [0], [1], [0, 0, 1, 1], [], []>} : vector<18x80xf32>, vector<80x144xf32>, vector<18x144xf32> -> vector<18x144xf32>
    %10 = arith.addf %5, %9 : vector<18x144xf32>
    %11 = vector.extract_strided_slice %1 {offsets = [2, 0], sizes = [18, 80], strides = [1, 1]} : vector<20x80xf32> to vector<18x80xf32>
    %c2 = arith.constant 2 : index
    %c0_8 = arith.constant 0 : index
    %c0_9 = arith.constant 0 : index
    %12 = vector.load %arg3[%c2, %c0_8, %c0_9] : memref<3x80x144xf32, #tpu.memory_space<vmem>>, vector<1x80x144xf32>
    %13 = vector.shape_cast %12 : vector<1x80x144xf32> to vector<80x144xf32>
    %cst_10 = arith.constant dense<0.000000e+00> : vector<18x144xf32>
    %14 = tpu.matmul %11, %13, %cst_10 {dimension_numbers = #tpu.dot_dimension_numbers<[1], [0], [0], [1], [0, 0, 1, 1], [], []>} : vector<18x80xf32>, vector<80x144xf32>, vector<18x144xf32> -> vector<18x144xf32>
    %15 = arith.addf %10, %14 : vector<18x144xf32>
    %c0_11 = arith.constant 0 : index
    %c0_12 = arith.constant 0 : index
    %16 = vector.load %arg4[%c0_11, %c0_12] : memref<1x144xf32, #tpu.memory_space<vmem>>, vector<1x144xf32>
    %17 = vector.broadcast %16 : vector<1x144xf32> to vector<18x144xf32>
    %18 = arith.addf %15, %17 : vector<18x144xf32>
    %cst_13 = arith.constant 0.000000e+00 : f32
    %19 = vector.broadcast %cst_13 : f32 to vector<18x144xf32>
    %20 = arith.maximumf %18, %19 : vector<18x144xf32>
    %c0_14 = arith.constant 0 : index
    %c0_15 = arith.constant 0 : index
    %21 = vector.load %arg8[%c0_14, %c0_15] : memref<18x144xf32, #tpu.memory_space<vmem>>, vector<18x144xf32>
    tpu.vector_store %arg8[%c0_14, %c0_15], %20 {strides = array<i32>} : memref<18x144xf32, #tpu.memory_space<vmem>>, vector<18x144xf32>,
    %cst_16 = arith.constant 0.000000e+00 : f32
    %22 = vector.broadcast %cst_16 : f32 to vector<144xf32>
    %c0_i32 = arith.constant 0 : i32
    %23 = arith.cmpi eq, %arg1, %c0_i32 : i32
    %24 = arith.extui %23 : i1 to i32
    %c0_i32_17 = arith.constant 0 : i32
    %25 = arith.cmpi ne, %24, %c0_i32_17 : i32
    scf.if %25 {
      %c0_40 = arith.constant 0 : index
      %c0_41 = arith.constant 0 : index
      %51 = vector.load %arg8[%c0_40, %c0_41] : memref<18x144xf32, #tpu.memory_space<vmem>>, vector<1x144xf32>
      %52 = vector.shape_cast %51 : vector<1x144xf32> to vector<144xf32>
      %53 = vector.shape_cast %22 : vector<144xf32> to vector<1x144xf32>
      tpu.vector_store %arg8[%c0_40, %c0_41], %53 {strides = array<i32>} : memref<18x144xf32, #tpu.memory_space<vmem>>, vector<1x144xf32>,
    } else {
    }
    %c0_i32_18 = arith.constant 0 : i32
    %26 = arith.cmpi eq, %arg1, %c0_i32_18 : i32
    %27 = arith.extui %26 : i1 to i32
    %c0_i32_19 = arith.constant 0 : i32
    %28 = arith.cmpi ne, %27, %c0_i32_19 : i32
    scf.if %28 {
      %c17 = arith.constant 17 : index
      %c0_40 = arith.constant 0 : index
      %51 = vector.load %arg8[%c17, %c0_40] : memref<18x144xf32, #tpu.memory_space<vmem>>, vector<1x144xf32>
      %52 = vector.shape_cast %51 : vector<1x144xf32> to vector<144xf32>
      %53 = vector.shape_cast %22 : vector<144xf32> to vector<1x144xf32>
      tpu.vector_store %arg8[%c17, %c0_40], %53 {strides = array<i32>} : memref<18x144xf32, #tpu.memory_space<vmem>>, vector<1x144xf32>,
    } else {
    }
    %c0_20 = arith.constant 0 : index
    %c0_21 = arith.constant 0 : index
    %29 = vector.load %arg8[%c0_20, %c0_21] : memref<18x144xf32, #tpu.memory_space<vmem>>, vector<18x144xf32>
    %30 = vector.extract_strided_slice %29 {offsets = [0, 0], sizes = [16, 144], strides = [1, 1]} : vector<18x144xf32> to vector<16x144xf32>
    %c0_22 = arith.constant 0 : index
    %c0_23 = arith.constant 0 : index
    %c0_24 = arith.constant 0 : index
    %31 = vector.load %arg5[%c0_22, %c0_23, %c0_24] : memref<3x144x128xf32, #tpu.memory_space<vmem>>, vector<1x144x128xf32>
    %32 = vector.shape_cast %31 : vector<1x144x128xf32> to vector<144x128xf32>
    %cst_25 = arith.constant dense<0.000000e+00> : vector<16x128xf32>
    %33 = tpu.matmul %30, %32, %cst_25 {dimension_numbers = #tpu.dot_dimension_numbers<[1], [0], [0], [1], [0, 0, 1, 1], [], []>} : vector<16x144xf32>, vector<144x128xf32>, vector<16x128xf32> -> vector<16x128xf32>
    %34 = vector.extract_strided_slice %29 {offsets = [1, 0], sizes = [16, 144], strides = [1, 1]} : vector<18x144xf32> to vector<16x144xf32>
    %c1_26 = arith.constant 1 : index
    %c0_27 = arith.constant 0 : index
    %c0_28 = arith.constant 0 : index
    %35 = vector.load %arg5[%c1_26, %c0_27, %c0_28] : memref<3x144x128xf32, #tpu.memory_space<vmem>>, vector<1x144x128xf32>
    %36 = vector.shape_cast %35 : vector<1x144x128xf32> to vector<144x128xf32>
    %cst_29 = arith.constant dense<0.000000e+00> : vector<16x128xf32>
    %37 = tpu.matmul %34, %36, %cst_29 {dimension_numbers = #tpu.dot_dimension_numbers<[1], [0], [0], [1], [0, 0, 1, 1], [], []>} : vector<16x144xf32>, vector<144x128xf32>, vector<16x128xf32> -> vector<16x128xf32>
    %38 = arith.addf %33, %37 : vector<16x128xf32>
    %39 = vector.extract_strided_slice %29 {offsets = [2, 0], sizes = [16, 144], strides = [1, 1]} : vector<18x144xf32> to vector<16x144xf32>
    %c2_30 = arith.constant 2 : index
    %c0_31 = arith.constant 0 : index
    %c0_32 = arith.constant 0 : index
    %40 = vector.load %arg5[%c2_30, %c0_31, %c0_32] : memref<3x144x128xf32, #tpu.memory_space<vmem>>, vector<1x144x128xf32>
    %41 = vector.shape_cast %40 : vector<1x144x128xf32> to vector<144x128xf32>
    %cst_33 = arith.constant dense<0.000000e+00> : vector<16x128xf32>
    %42 = tpu.matmul %39, %41, %cst_33 {dimension_numbers = #tpu.dot_dimension_numbers<[1], [0], [0], [1], [0, 0, 1, 1], [], []>} : vector<16x144xf32>, vector<144x128xf32>, vector<16x128xf32> -> vector<16x128xf32>
    %43 = arith.addf %38, %42 : vector<16x128xf32>
    %c0_34 = arith.constant 0 : index
    %c0_35 = arith.constant 0 : index
    %44 = vector.load %arg6[%c0_34, %c0_35] : memref<1x128xf32, #tpu.memory_space<vmem>>, vector<1x128xf32>
    %45 = vector.broadcast %44 : vector<1x128xf32> to vector<16x128xf32>
    %46 = arith.addf %43, %45 : vector<16x128xf32>
    %cst_36 = arith.constant 0.000000e+00 : f32
    %47 = vector.broadcast %cst_36 : f32 to vector<16x128xf32>
    %48 = arith.maximumf %46, %47 : vector<16x128xf32>
    %49 = vector.shape_cast %48 : vector<16x128xf32> to vector<1x16x128xf32>
    %c0_37 = arith.constant 0 : index
    %c0_38 = arith.constant 0 : index
    %c0_39 = arith.constant 0 : index
    %50 = vector.load %arg7[%c0_37, %c0_38, %c0_39] : memref<1x16x128xf32, #tpu.memory_space<vmem>>, vector<1x16x128xf32>
    tpu.vector_store %arg7[%c0_37, %c0_38, %c0_39], %49 {strides = array<i32>} : memref<1x16x128xf32, #tpu.memory_space<vmem>>, vector<1x16x128xf32>,
    return
  }
  func.func @transform_0(%arg0: i32, %arg1: i32) -> (i32, i32, i32) {
    %c0_i32 = arith.constant 0 : i32
    %c0_i32_0 = arith.constant 0 : i32
    %c0_i32_1 = arith.constant 0 : i32
    return %arg0, %c0_i32, %c0_i32_0 : i32, i32, i32
  }
  func.func @transform_1(%arg0: i32, %arg1: i32) -> (i32, i32, i32) {
    %c0_i32 = arith.constant 0 : i32
    %c0_i32_0 = arith.constant 0 : i32
    %c0_i32_1 = arith.constant 0 : i32
    %c0_i32_2 = arith.constant 0 : i32
    return %c0_i32, %c0_i32_0, %c0_i32_1 : i32, i32, i32
  }
  func.func @transform_2(%arg0: i32, %arg1: i32) -> (i32, i32) {
    %c0_i32 = arith.constant 0 : i32
    %c0_i32_0 = arith.constant 0 : i32
    %c0_i32_1 = arith.constant 0 : i32
    return %c0_i32, %c0_i32_0 : i32, i32
  }
  func.func @transform_3(%arg0: i32, %arg1: i32) -> (i32, i32, i32) {
    %c0_i32 = arith.constant 0 : i32
    %c0_i32_0 = arith.constant 0 : i32
    %c0_i32_1 = arith.constant 0 : i32
    %c0_i32_2 = arith.constant 0 : i32
    return %c0_i32, %c0_i32_0, %c0_i32_1 : i32, i32, i32
  }
  func.func @transform_4(%arg0: i32, %arg1: i32) -> (i32, i32) {
    %c0_i32 = arith.constant 0 : i32
    %c0_i32_0 = arith.constant 0 : i32
    %c0_i32_1 = arith.constant 0 : i32
    return %c0_i32, %c0_i32_0 : i32, i32
  }
  func.func @transform_5(%arg0: i32, %arg1: i32) -> (i32, i32, i32) {
    %c0_i32 = arith.constant 0 : i32
    %c0_i32_0 = arith.constant 0 : i32
    return %arg0, %arg1, %c0_i32 : i32, i32, i32
  }
}

</mosaic_0001>

<bundles_post_ra>
// kernel: conv_block_forward.1
= control target key start
LH: loop header
LB: loop body
LE: loop exit
PB: predicated region body
PF: predicated region fallthrough
CT: control target
= control target key end

     0   :  { %s1411_s18 = smov 0   ;;  %s1413_s19 = smov 0   ;;  %s1912_s0 = inlined_call_operand.vmem [shape: f32[2,20,80], index: 0, kind: input, shape index: {}]   ;;  %s1913_s1 = inlined_call_operand.vmem [shape: f32[3,80,144], index: 1, kind: input, shape index: {}]   ;;  %s1914_s2 = inlined_call_operand.vmem [shape: f32[1,144], index: 2, kind: input, shape index: {}]   ;;  %s1915_s3 = inlined_call_operand.vmem [shape: f32[3,144,128], index: 3, kind: input, shape index: {}]   ;;  %s1916_s4 = inlined_call_operand.vmem [shape: f32[1,128], index: 4, kind: input, shape index: {}]   ;;  %s1917_s5 = inlined_call_operand.vmem [shape: f32[2,16,128], index: 5, kind: output, shape index: {}]  }
   0x1   :  { %s1415_s20 = smov 0  }
   0x2 LB: > { %s27_s21 = sadd.s32 1, %s1373_s19  ;;  %p1076_p0 = scmp.ge.s32.totalorder %s1377_s20, 1  ;;  %s1377_s20 = sphi %s1415_s20, %s15_s20   ;;  %s1373_s19 = sphi %s1413_s19, %s1921_s19   ;;  %s1369_s18 = sphi %s1411_s18, %s1920_s18  }
   0x3   : > { %p29_p1 = scmp.ge.s32.totalorder %s27_s21, 2  ;;  %p201_p2 = scmp.lt.s32.totalorder %s1377_s20, 3 }
   0x5   : > { %s1923_s21 = smov (%p29_p1, %s27_s21), 0  ;;  %p202_p3 = pnand %p1076_p0, %p201_p2 }
   0x6   : > { %v252_v0 = vld [vmem:[%s1913_s1 + $0x8] sm:$0xff] (!%p202_p3)  ;;  %v254_v1 = vld [vmem:[%s1913_s1 + $0x18] sm:$0xff] (!%p202_p3)  ;;  %v251_v2 = vld [vmem:[%s1913_s1] sm:$0xff] (!%p202_p3)  ;;  %v1379_v7 = vmov (!%p202_p3), 0.0   ;;  %p233_p4 = scmp.lt.s32.totalorder (!%p202_p3), %s1369_s18, 1  ;;  %vm301_vm0 = vcmask (!%p202_p3), 654336  }
   0x7   : > { %205 = sbr.rel (%p202_p3) target bundleno = 545 (0x221), region = 40  ;;  %v1195_v3 = vpack.c.bf16 (!%p202_p3), %v254_v1, %v252_v0  ;;  %v253_v4 = vld [vmem:[%s1913_s1 + $0x10] sm:$0xff] (!%p202_p3)  ;;  %v256_v5 = vld [vmem:[%s1913_s1 + $0x28] sm:$0xff] (!%p202_p3)  ;;  %v258_v6 = vld [vmem:[%s1913_s1 + $0x38] sm:$0xff] (!%p202_p3)  ;;  %461 = vmatprep.mubr.f32.mxu0 (!%p202_p3), %v1379_v7  ;;  %372 = vmatprep.mubr.f32.mxu1 (!%p202_p3), %v1379_v7  ;;  %vm295_vm1 = vcmask (!%p202_p3), 1046528   ;;  %vm501_vm2 = vcmask (!%p202_p3), 1045504  }
   0x8   : > { %v1197_v8 = vpack.c.bf16 (!%p202_p3), %v253_v4, %v251_v2  ;;  %v1199_v9 = vpack.c.bf16 (!%p202_p3), %v258_v6, %v256_v5  ;;  %v255_v10 = vld [vmem:[%s1913_s1 + $0x20] sm:$0xff] (!%p202_p3)  ;;  %v257_v11 = vld [vmem:[%s1913_s1 + $0x30] sm:$0xff] (!%p202_p3)  ;;  %v260_v12 = vld [vmem:[%s1913_s1 + $0x48] sm:$0xff] (!%p202_p3)  ;;  %vm627_vm3 = vcmask (!%p202_p3), 130048   ;;  %vm632_vm5 = vcmask (!%p202_p3), 123904  }
   0x9   : > { %1196 = vmatprep.subr.bf16.mxu0 (!%p202_p3), %v1195_v3  ;;  %v262_v13 = vld [vmem:[%s1913_s1 + $0x58] sm:$0xff] (!%p202_p3)  ;;  %v1201_v14 = vpack.c.bf16 (!%p202_p3), %v257_v11, %v255_v10  ;;  %v259_v16 = vld [vmem:[%s1913_s1 + $0x40] sm:$0xff] (!%p202_p3)  ;;  %v261_v17 = vld [vmem:[%s1913_s1 + $0x50] sm:$0xff] (!%p202_p3) }
   0xa   : > { %1198 = vmatpush1.bf16.msra.mxu0 (!%p202_p3), %v1197_v8  ;;  %v1203_v15 = vpack.c.bf16 (!%p202_p3), %v262_v13, %v260_v12  ;;  %v264_v18 = vld [vmem:[%s1913_s1 + $0x68] sm:$0xff] (!%p202_p3)  ;;  %v266_v19 = vld [vmem:[%s1913_s1 + $0x78] sm:$0xff] (!%p202_p3)  ;;  %v1080_v22 = vld [vmem:[%s1913_s1 + $0xa0] sm:$0xff] (!%p202_p3)  ;;  %v1205_v24 = vpack.c.bf16 (!%p202_p3), %v261_v17, %v259_v16 }
   0xb   : > { %1200 = vmatprep.subr.bf16.mxu0 (!%p202_p3), %v1199_v9  ;;  %v1081_v20 = vld [vmem:[%s1913_s1 + $0xa8] sm:$0xff] (!%p202_p3)  ;;  %v1083_v21 = vld [vmem:[%s1913_s1 + $0xb8] sm:$0xff] (!%p202_p3)  ;;  %v1082_v23 = vld [vmem:[%s1913_s1 + $0xb0] sm:$0xff] (!%p202_p3)  ;;  %v1207_v29 = vpack.c.bf16 (!%p202_p3), %v266_v19, %v264_v18 }
   0xc   : > { %v263_v25 = vld [vmem:[%s1913_s1 + $0x60] sm:$0xff] (!%p202_p3)  ;;  %v265_v26 = vld [vmem:[%s1913_s1 + $0x70] sm:$0xff] (!%p202_p3)  ;;  %v1175_v27 = vpack.c.bf16 (!%p202_p3), %v1083_v21, %v1081_v20  ;;  %v1177_v28 = vpack.c.bf16 (!%p202_p3), %v1082_v23, %v1080_v22  ;;  %v268_v30 = vld [vmem:[%s1913_s1 + $0x88] sm:$0xff] (!%p202_p3) }
   0xd   : > { %v270_v31 = vld [vmem:[%s1913_s1 + $0x98] sm:$0xff] (!%p202_p3)  ;;  %v1085_v32 = vld [vmem:[%s1913_s1 + $0xc8] sm:$0xff] (!%p202_p3)  ;;  %v1084_v34 = vld [vmem:[%s1913_s1 + $0xc0] sm:$0xff] (!%p202_p3)  ;;  %v1209_v38 = vpack.c.bf16 (!%p202_p3), %v265_v26, %v263_v25 }
   0xe   : > { %1202 = vmatpush1.bf16.msra.mxu0 %v1201_v14  ;;  %s1925_s18 = smov (!%p233_p4, %s1369_s18), 1  ;;  %1176 = vmatprep.subr.bf16.mxu1 %v1175_v27  ;;  %v1087_v33 = vld [vmem:[%s1913_s1 + $0xd8] sm:$0xff]  ;;  %v1086_v35 = vld [vmem:[%s1913_s1 + $0xd0] sm:$0xff]  ;;  %v267_v39 = vld [vmem:[%s1913_s1 + $0x80] sm:$0xff]  ;;  %v1211_v42 = vpack.c.bf16 %v270_v31, %v268_v30  ;;  %v1380_v31 = vmov 0.0|0.0  }
   0xf   : > { %1204 = vmatprep.subr.bf16.mxu0 %v1203_v15  ;;  %1178 = vmatpush1.bf16.msra.mxu1 %v1177_v28  ;;  %v1179_v36 = vpack.c.bf16 %v1087_v33, %v1085_v32  ;;  %v1181_v37 = vpack.c.bf16 %v1086_v35, %v1084_v34  ;;  %v1089_v40 = vld [vmem:[%s1913_s1 + $0xe8] sm:$0xff]  ;;  %v1091_v41 = vld [vmem:[%s1913_s1 + $0xf8] sm:$0xff]  ;;  %v269_v43 = vld [vmem:[%s1913_s1 + $0x90] sm:$0xff]  ;;  %s1328_s15 = smul.u32 24, %s1925_s18  ;;  %s1174_s28 = sshll.u32 %s1925_s18, 4 }
  0x10   : > { %v1183_v44 = vpack.c.bf16 %v1091_v41, %v1089_v40  ;;  %v1088_v45 = vld [vmem:[%s1913_s1 + $0xe0] sm:$0xff]  ;;  %v1090_v46 = vld [vmem:[%s1913_s1 + $0xf0] sm:$0xff]  ;;  %v1107_v47 = vld [vmem:[%s1913_s1 + $0x148] sm:$0xff]  ;;  %v1213_v52 = vpack.c.bf16 %v269_v43, %v267_v39  ;;  %s246_s6 = scalar_lea.vmem %s1917_s5, %s1174_s28 }
  0x11   : > { %1180 = vmatprep.subr.bf16.mxu1 %v1179_v36  ;;  %v1109_v48 = vld [vmem:[%s1913_s1 + $0x158] sm:$0xff]  ;;  %v1185_v49 = vpack.c.bf16 %v1090_v46, %v1088_v45  ;;  %v1093_v50 = vld [vmem:[%s1913_s1 + $0x108] sm:$0xff]  ;;  %v1092_v54 = vld [vmem:[%s1913_s1 + $0x100] sm:$0xff]  ;;  %s1557_s13 = scalar_lea.vmem %s1912_s0, %s1328_s15 }
  0x12   : > { %1206 = vmatpush1.bf16.msra.mxu0 %v1205_v24  ;;  %v1095_v51 = vld [vmem:[%s1913_s1 + $0x118] sm:$0xff]  ;;  %v1094_v55 = vld [vmem:[%s1913_s1 + $0x110] sm:$0xff]  ;;  %v1215_v56 = vpack.c.bf16 %v1109_v48, %v1107_v47  ;;  %v1106_v57 = vld [vmem:[%s1913_s1 + $0x140] sm:$0xff] }
  0x13   : > { %1208 = vmatprep.subr.bf16.mxu0 %v1207_v29  ;;  %1182 = vmatpush1.bf16.msra.mxu1 %v1181_v37  ;;  %v1187_v53 = vpack.c.bf16 %v1095_v51, %v1093_v50  ;;  %v1108_v58 = vld [vmem:[%s1913_s1 + $0x150] sm:$0xff]  ;;  %v1111_v59 = vld [vmem:[%s1913_s1 + $0x168] sm:$0xff]  ;;  %v1113_v60 = vld [vmem:[%s1913_s1 + $0x178] sm:$0xff]  ;;  %v1189_v63 = vpack.c.bf16 %v1094_v55, %v1092_v54 }
  0x14   : > { %1184 = vmatprep.subr.bf16.mxu1 %v1183_v44  ;;  %v1097_v61 = vld [vmem:[%s1913_s1 + $0x128] sm:$0xff]  ;;  %v1099_v62 = vld [vmem:[%s1913_s1 + $0x138] sm:$0xff]  ;;  %v1578_v0 = vld [vmem:[%s1557_s13] sm:$0xff]  ;;  %v1217_v1 = vpack.c.bf16 %v1108_v58, %v1106_v57  ;;  %v1219_v4 = vpack.c.bf16 %v1113_v60, %v1111_v59 }
  0x15   : > { %v1096_v2 = vld [vmem:[%s1913_s1 + $0x120] sm:$0xff]  ;;  %v1098_v3 = vld [vmem:[%s1913_s1 + $0x130] sm:$0xff]  ;;  %v1191_v8 = vpack.c.bf16 %v1099_v62, %v1097_v61  ;;  %v1115_v9 = vld [vmem:[%s1913_s1 + $0x188] sm:$0xff]  ;;  %v296_v12 = vrot.slane %v1578_v0, 1  ;;  %v502_v44 = vrot.slane %v1578_v0, 2 }
  0x16   : > { %1210 = vmatpush1.bf16.msra.mxu0 %v1209_v38  ;;  %v1110_v5 = vld [vmem:[%s1913_s1 + $0x160] sm:$0xff]  ;;  %v1112_v6 = vld [vmem:[%s1913_s1 + $0x170] sm:$0xff]  ;;  %v1117_v10 = vld [vmem:[%s1913_s1 + $0x198] sm:$0xff]  ;;  %v1193_v14 = vpack.c.bf16 %v1098_v3, %v1096_v2 }
  0x17   : > { %1212 = vmatprep.subr.bf16.mxu0 %v1211_v42  ;;  %1186 = vmatpush1.bf16.msra.mxu1 %v1185_v49  ;;  %v1599_v11 = vld [vmem:[%s1557_s13 + $0x8] sm:$0xff]  ;;  %v1221_v15 = vpack.c.bf16 %v1112_v6, %v1110_v5  ;;  %v1114_v16 = vld [vmem:[%s1913_s1 + $0x180] sm:$0xff]  ;;  %v1223_v17 = vpack.c.bf16 %v1117_v10, %v1115_v9  ;;  %v1116_v18 = vld [vmem:[%s1913_s1 + $0x190] sm:$0xff] }
  0x18   : > { %1188 = vmatprep.subr.bf16.mxu1 %v1187_v53  ;;  %v297_v13 = vrot.slane %v1599_v11, 1  ;;  %v1119_v19 = vld [vmem:[%s1913_s1 + $0x1a8] sm:$0xff]  ;;  %v1121_v20 = vld [vmem:[%s1913_s1 + $0x1b8] sm:$0xff]  ;;  %v1619_v21 = vld [vmem:[%s1557_s13 + $0x10] sm:$0xf]  ;;  %v1225_v26 = vpack.c.bf16 %v1116_v18, %v1114_v16  ;;  %v503_v45 = vrot.slane %v1599_v11, 2 }
  0x19   : > { %v1129_v22 = vld [vmem:[%s1915_s3 + $0x90] sm:$0xff]  ;;  %v1130_v23 = vld [vmem:[%s1915_s3 + $0x98] sm:$0xff]  ;;  %v299_v24 = vrot.slane %v1619_v21, 1  ;;  %v1227_v27 = vpack.c.bf16 %v1121_v20, %v1119_v19  ;;  %v1118_v28 = vld [vmem:[%s1913_s1 + $0x1a0] sm:$0xff]  ;;  %v505_v50 = vrot.slane %v1619_v21, 2 }
  0x1a   : > { %1214 = vmatpush1.bf16.msra.mxu0 %v1213_v52  ;;  %v298_v25 = vsel %vm295_vm1, %v296_v12, %v297_v13  ;;  %v1120_v29 = vld [vmem:[%s1913_s1 + $0x1b0] sm:$0xff]  ;;  %v1123_v30 = vld [vmem:[%s1913_s1 + $0x1c8] sm:$0xff]  ;;  %v1236_v32 = vpack.c.bf16 %v1130_v23, %v1129_v22  ;;  %v1125_v33 = vld [vmem:[%s1913_s1 + $0x1d8] sm:$0xff]  ;;  %v504_v51 = vsel %vm501_vm2, %v502_v44, %v503_v45 }
  0x1b   : > { %1216 = vmatprep.subr.bf16.mxu0 %v1215_v56  ;;  %1190 = vmatpush1.bf16.msra.mxu1 %v1189_v63  ;;  %v1131_v34 = vld [vmem:[%s1915_s3 + $0xa0] sm:$0xff]  ;;  %v1132_v35 = vld [vmem:[%s1915_s3 + $0xa8] sm:$0xff]  ;;  %v300_v36 = vsel %vm295_vm1, %v297_v13, %v299_v24  ;;  %v1229_v37 = vpack.c.bf16 %v1120_v29, %v1118_v28  ;;  %v1231_v38 = vpack.c.bf16 %v1125_v33, %v1123_v30  ;;  %v1124_v40 = vld [vmem:[%s1913_s1 + $0x1d0] sm:$0xff] }
  0x1c   : > { %1192 = vmatprep.subr.bf16.mxu1 %v1191_v8  ;;  %v1122_v39 = vld [vmem:[%s1913_s1 + $0x1c0] sm:$0xff]  ;;  %v1239_v41 = vpack.c.bf16 %v1132_v35, %v1131_v34  ;;  %v1133_v42 = vld [vmem:[%s1915_s3 + $0xb0] sm:$0xff]  ;;  %v1134_v43 = vld [vmem:[%s1915_s3 + $0xb8] sm:$0xff]  ;;  %v506_v55 = vsel %vm501_vm2, %v503_v45, %v505_v50  ;;  %v604_v35 = vlaneseq }
  0x1d   : > { %1103 = vmatmul.mubr.msk.f32.vlgmr.msra.gmra.mrb[0].mxu0 %vm301_vm0, %v1578_v0  ;;  %v1233_v46 = vpack.c.bf16 %v1124_v40, %v1122_v39  ;;  %v1151_v47 = vld [vmem:[%s1915_s3 + $0x120] sm:$0xff]  ;;  %v1152_v48 = vld [vmem:[%s1915_s3 + $0x128] sm:$0xff]  ;;  %v1242_v49 = vpack.c.bf16 %v1134_v43, %v1133_v42  ;;  %v1153_v53 = vld [vmem:[%s1915_s3 + $0x130] sm:$0xff] }
  0x1e   : > { %1218 = vmatpush1.bf16.msra.mxu0 %v1217_v1  ;;  %467 = vmatprep.mubr.f32.mxu0 %v1379_v7  ;;  %v1290_v52 = vpack.c.bf16 %v1152_v48, %v1151_v47  ;;  %v1154_v54 = vld [vmem:[%s1915_s3 + $0x138] sm:$0xff]  ;;  %v1155_v57 = vld [vmem:[%s1915_s3 + $0x140] sm:$0xff]  ;;  %v1156_v58 = vld [vmem:[%s1915_s3 + $0x148] sm:$0xff]  ;;  %vm1793_vm4 = vcmp.lt.s32.totalorder %v604_v35, 144 }
  0x1f   : > { %1220 = vmatprep.subr.bf16.mxu0 %v1219_v4  ;;  %1194 = vmatpush1.bf16.msra.mxu1 %v1193_v14  ;;  %v1293_v56 = vpack.c.bf16 %v1154_v54, %v1153_v53  ;;  %v1296_v59 = vpack.c.bf16 %v1156_v58, %v1155_v57  ;;  %v1135_v60 = vld [vmem:[%s1915_s3 + $0xc0] sm:$0xff]  ;;  %v1136_v61 = vld [vmem:[%s1915_s3 + $0xc8] sm:$0xff]  ;;  %v1157_v63 = vld [vmem:[%s1915_s3 + $0x150] sm:$0xff] }
  0x20   : > { %1235 = vmatprep.subr.bf16.mxu1 %v1380_v31  ;;  %v1245_v62 = vpack.c.bf16 %v1136_v61, %v1135_v60  ;;  %v1158_v0 = vld [vmem:[%s1915_s3 + $0x158] sm:$0xff]  ;;  %v1137_v2 = vld [vmem:[%s1915_s3 + $0xd0] sm:$0xff]  ;;  %v1159_v5 = vld [vmem:[%s1915_s3 + $0x160] sm:$0xff] }
  0x21   : > { %1104 = vmatmul.mubr.msk.f32.gmra.mrb[2].mxu0 %vm301_vm0, %v1599_v11  ;;  %v1299_v1 = vpack.c.bf16 %v1158_v0, %v1157_v63  ;;  %v1138_v3 = vld [vmem:[%s1915_s3 + $0xd8] sm:$0xff]  ;;  %v1160_v6 = vld [vmem:[%s1915_s3 + $0x168] sm:$0xff]  ;;  %v1139_v9 = vld [vmem:[%s1915_s3 + $0xe0] sm:$0xff] }
  0x22   : > { %1222 = vmatpush1.bf16.msra.mxu0 %v1221_v15  ;;  %473 = vmatprep.mubr.f32.mxu0 %v1379_v7  ;;  %v1248_v4 = vpack.c.bf16 %v1138_v3, %v1137_v2  ;;  %v1302_v8 = vpack.c.bf16 %v1160_v6, %v1159_v5  ;;  %v1140_v10 = vld [vmem:[%s1915_s3 + $0xe8] sm:$0xff]  ;;  %v1161_v12 = vld [vmem:[%s1915_s3 + $0x170] sm:$0xff]  ;;  %v1162_v13 = vld [vmem:[%s1915_s3 + $0x178] sm:$0xff] }
  0x23   : > { %1224 = vmatprep.subr.bf16.mxu0 %v1223_v17  ;;  %1100 = vmatmul.mubr.msk.f32.vlgmr.msra.gmra.mrb[0].mxu1 %vm301_vm0, %v298_v25  ;;  %v1251_v11 = vpack.c.bf16 %v1140_v10, %v1139_v9  ;;  %v1305_v14 = vpack.c.bf16 %v1162_v13, %v1161_v12  ;;  %v1141_v15 = vld [vmem:[%s1915_s3 + $0xf0] sm:$0xff]  ;;  %v1142_v16 = vld [vmem:[%s1915_s3 + $0xf8] sm:$0xff]  ;;  %v1163_v18 = vld [vmem:[%s1915_s3 + $0x180] sm:$0xff] }
  0x24   : > { %378 = vmatprep.mubr.f32.mxu1 %v1379_v7  ;;  %1237 = vmatpush1.bf16.msra.mxu1 %v1236_v32  ;;  %v1254_v17 = vpack.c.bf16 %v1142_v16, %v1141_v15  ;;  %v1164_v19 = vld [vmem:[%s1915_s3 + $0x188] sm:$0xff]  ;;  %v1166_v25 = vld [vmem:[%s1915_s3 + $0x198] sm:$0xff]  ;;  %v1167_v29 = vld [vmem:[%s1915_s3 + $0x1a0] sm:$0xff] }
  0x25   : > { %1105 = vmatmul.mubr.msk.f32.gmra.mrb[4].mxu0 %vm301_vm0, %v1619_v21  ;;  %1238 = vmatprep.subr.bf16.mxu1 %v1380_v31  ;;  %v1308_v20 = vpack.c.bf16 %v1164_v19, %v1163_v18  ;;  %v1143_v21 = vld [vmem:[%s1915_s3 + $0x100] sm:$0xff]  ;;  %v1144_v22 = vld [vmem:[%s1915_s3 + $0x108] sm:$0xff]  ;;  %v1146_v28 = vld [vmem:[%s1915_s3 + $0x118] sm:$0xff] }
  0x26   : > { %1226 = vmatpush1.bf16.msra.mxu0 %v1225_v26  ;;  %577 = vmatprep.mubr.f32.mxu0 %v1379_v7  ;;  %v1257_v23 = vpack.c.bf16 %v1144_v22, %v1143_v21  ;;  %v1168_v32 = vld [vmem:[%s1915_s3 + $0x1a8] sm:$0xff]  ;;  %v602_v42 = vld [vmem:[%s1914_s2] sm:$0x3]  ;;  %v655_v22 = vld [vmem:[%s1915_s3 + $0x10] sm:$0xff] }
  0x27   : > { %1228 = vmatprep.subr.bf16.mxu0 %v1227_v27  ;;  %1101 = vmatmul.mubr.msk.f32.gmra.mrb[2].mxu1 %vm301_vm0, %v300_v36  ;;  %v1145_v27 = vld [vmem:[%s1915_s3 + $0x110] sm:$0xff]  ;;  %v1314_v33 = vpack.c.bf16 %v1168_v32, %v1167_v29  ;;  %v654_v12 = vld [vmem:[%s1915_s3 + $0x8] sm:$0xff]  ;;  %v669_v58 = vld [vmem:[%s1915_s3 + $0x80] sm:$0xff] }
  0x28   : > { %384 = vmatprep.mubr.f32.mxu1 %v1379_v7  ;;  %1240 = vmatpush1.bf16.msra.mxu1 %v1239_v41  ;;  %v1260_v30 = vpack.c.bf16 %v1146_v28, %v1145_v27 }
  0x29   : > { %1241 = vmatprep.subr.bf16.mxu1 %v1380_v31 }
  0x2a   : > { %1230 = vmatpush1.bf16.msra.mxu0 %v1229_v37  ;;  %v605_v37 = vshrl.u32 %v604_v35, 7 }
  0x2b   : > { %1232 = vmatprep.subr.bf16.mxu0 %v1231_v38  ;;  %1102 = vmatmul.mubr.msk.f32.gmra.mrb[4].mxu1 %vm301_vm0, %v299_v24  ;;  %v1165_v24 = vld [vmem:[%s1915_s3 + $0x190] sm:$0xff] }
  0x2c   : > { %1243 = vmatpush1.bf16.msra.mxu1 %v1242_v49  ;;  %v1311_v26 = vpack.c.bf16 %v1166_v25, %v1165_v24  ;;  %v606_v40 = vsub.s32 0, %v605_v37  ;;  %v610_v43 = vsub.s32 1, %v605_v37  ;;  %v658_v37 = vld [vmem:[%s1915_s3 + $0x28] sm:$0xff] }
  0x2d   : > { %1244 = vmatprep.subr.bf16.mxu1 %v1380_v31 }
  0x2e   : > { %1234 = vmatpush1.bf16.msra.mxu0 %v1233_v46  ;;  %v607_v45 = vrot.slane %v602_v42, %v606_v40  ;;  %v611_v47 = vrot.slane %v602_v42, %v610_v43  ;;  %v659_v43 = vld [vmem:[%s1915_s3 + $0x30] sm:$0xff] }
  0x2f   : > { %1289 = vmatprep.subr.bf16.mxu0 %v1380_v31 }
  0x30   : > { %1246 = vmatpush1.bf16.msra.mxu1 %v1245_v62 }
  0x31   : > { %1126 = vmatmul.mubr.msk.f32.vlgmr.msra.gmra.mrb[0].mxu0 %vm301_vm0, %v504_v51  ;;  %1247 = vmatprep.subr.bf16.mxu1 %v1380_v31 }
  0x32   : > { %583 = vmatprep.mubr.f32.mxu0 %v1379_v7  ;;  %1291 = vmatpush1.bf16.msra.mxu0 %v1290_v52 }
  0x33   : > { %1292 = vmatprep.subr.bf16.mxu0 %v1380_v31 }
  0x34   : > { %1249 = vmatpush1.bf16.msra.mxu1 %v1248_v4 }
  0x35   : > { %1127 = vmatmul.mubr.msk.f32.gmra.mrb[2].mxu0 %vm301_vm0, %v506_v55  ;;  %1250 = vmatprep.subr.bf16.mxu1 %v1380_v31 }
  0x36   : > { %589 = vmatprep.mubr.f32.mxu0 %v1379_v7  ;;  %1294 = vmatpush1.bf16.msra.mxu0 %v1293_v56 }
  0x37   : > { %1295 = vmatprep.subr.bf16.mxu0 %v1380_v31 }
  0x38   : > { %1252 = vmatpush1.bf16.msra.mxu1 %v1251_v11  ;;  %v653_v11 = vld [vmem:[%s1915_s3] sm:$0xff] }
  0x39   : > { %1128 = vmatmul.mubr.msk.f32.gmra.mrb[4].mxu0 %vm301_vm0, %v505_v50  ;;  %1253 = vmatprep.subr.bf16.mxu1 %v1380_v31 }
  0x3a   : > { %1297 = vmatpush1.bf16.msra.mxu0 %v1296_v59 }
  0x3b   : > { %1298 = vmatprep.subr.bf16.mxu0 %v1380_v31 }
  0x3c   : > { %1255 = vmatpush1.bf16.msra.mxu1 %v1254_v17 }
  0x3d   : > { %1256 = vmatprep.subr.bf16.mxu1 %v1380_v31 }
  0x3e   : > { %1300 = vmatpush1.bf16.msra.mxu0 %v1299_v1 }
  0x3f   : > { %1301 = vmatprep.subr.bf16.mxu0 %v1380_v31 }
  0x40   : > { %1258 = vmatpush1.bf16.msra.mxu1 %v1257_v23  ;;  %v656_v23 = vld [vmem:[%s1915_s3 + $0x18] sm:$0xff] }
  0x41   : > { %1259 = vmatprep.subr.bf16.mxu1 %v1380_v31  ;;  %v1266_v29 = vpack.c.bf16 %v656_v23, %v655_v22 }
  0x42   : > { %1303 = vmatpush1.bf16.msra.mxu0 %v1302_v8 }
  0x43   : > { %1304 = vmatprep.subr.bf16.mxu0 %v1380_v31 }
  0x44   : > { %1261 = vmatpush1.bf16.msra.mxu1 %v1260_v30 }
  0x45   : > { %1262 = vmatprep.subr.bf16.mxu1 %v1380_v31 }
  0x46   : > { %1306 = vmatpush1.bf16.msra.mxu0 %v1305_v14 }
  0x47   : > { %1307 = vmatprep.subr.bf16.mxu0 %v1380_v31 }
  0x4a   : > { %1309 = vmatpush1.bf16.msra.mxu0 %v1308_v20  ;;  %v1263_v20 = vpack.c.bf16 %v654_v12, %v653_v11 }
  0x4b   : > { %1310 = vmatprep.subr.bf16.mxu0 %v1380_v31 }
  0x4e   : > { %1312 = vmatpush1.bf16.msra.mxu0 %v1311_v26 }
  0x4f   : > { %1313 = vmatprep.subr.bf16.mxu0 %v1380_v31 }
  0x52   : > { %1315 = vmatpush1.bf16.msra.mxu0 %v1314_v33 }
  0xf6   : > { %v374_v34 = vpop.f32.mrb[0].mxu1 }
  0xf7   : > { %v376_v36 = vpop.f32.mrb[1].mxu1 }
  0xfa   : > { %v380_v38 = vpop.f32.mrb[2].mxu1 }
  0xfb   : > { %v382_v39 = vpop.f32.mrb[3].mxu1 }
  0xfe   : > { %v386_v41 = vpop.f32.mrb[4].mxu1 }
  0xff   : > { %v388_v44 = vpop.f32.mrb[5].mxu1 }
 0x104   : > { %v579_v46 = vpop.f32.mrb[0].mxu0 }
 0x105   : > { %v1316_v48 = vadd.f32 %v579_v46, %v374_v34  ;;  %v581_v49 = vpop.f32.mrb[1].mxu0  ;;  %v661_v46 = vld [vmem:[%s1915_s3 + $0x40] sm:$0xff] }
 0x106   : > { %v1317_v50 = vadd.f32 %v581_v49, %v376_v36  ;;  %v657_v36 = vld [vmem:[%s1915_s3 + $0x20] sm:$0xff]  ;;  %v663_v49 = vld [vmem:[%s1915_s3 + $0x50] sm:$0xff] }
 0x107   : > { %v614_v51 = vadd.f32 %v1316_v48, %v607_v45  ;;  %v1269_v42 = vpack.c.bf16 %v658_v37, %v657_v36 }
 0x108   : > { %v615_v52 = vadd.f32 %v1317_v50, %v611_v47  ;;  %v585_v53 = vpop.f32.mrb[2].mxu0  ;;  %v664_v50 = vld [vmem:[%s1915_s3 + $0x58] sm:$0xff] }
 0x109   : > { %v620_v54 = vmax.f32 %v614_v51, 0.0  ;;  %v1318_v55 = vadd.f32 %v585_v53, %v380_v38  ;;  %v587_v56 = vpop.f32.mrb[3].mxu0  ;;  %v1278_v51 = vpack.c.bf16 %v664_v50, %v663_v49  ;;  %v666_v53 = vld [vmem:[%s1915_s3 + $0x68] sm:$0xff] }
 0x10a   : > { %v621_v57 = vmax.f32 %v615_v52, 0.0  ;;  %v1319_v59 = vadd.f32 %v587_v56, %v382_v39  ;;  %v665_v52 = vld [vmem:[%s1915_s3 + $0x60] sm:$0xff]  ;;  %v668_v56 = vld [vmem:[%s1915_s3 + $0x78] sm:$0xff] }
 0x10b   : > { %626 = vst [vmem:[#allocation2] sm:$0xff] %v620_v54  ;;  %v616_v60 = vadd.f32 %v1318_v55, %v607_v45  ;;  %v1281_v54 = vpack.c.bf16 %v666_v53, %v665_v52  ;;  %v667_v55 = vld [vmem:[%s1915_s3 + $0x70] sm:$0xff] }
 0x10c   : > { %628 = vst.msk [vmem:[#allocation2 + $0x8] sm:$0xff] %vm627_vm3, %v621_v57  ;;  %v617_v61 = vadd.f32 %v1319_v59, %v611_v47  ;;  %v591_v62 = vpop.f32.mrb[4].mxu0  ;;  %v1284_v57 = vpack.c.bf16 %v668_v56, %v667_v55  ;;  %v670_v59 = vld [vmem:[%s1915_s3 + $0x88] sm:$0xff] }
 0x10d   : > { %642 = vst.msk [vmem:[#allocation2] ss:$8 sm:$0x3] %vm1793_vm4, %v1379_v7  ;;  %v1801_v63 = vmax.f32 %v616_v60, 0.0  ;;  %v1320_v0 = vadd.f32 %v591_v62, %v386_v41  ;;  %v593_v1 = vpop.f32.mrb[5].mxu0  ;;  %v1287_v60 = vpack.c.bf16 %v670_v59, %v669_v58 }
 0x10e   : > { %v623_v2 = vmax.f32 %v617_v61, 0.0  ;;  %v1321_v3 = vadd.f32 %v593_v1, %v388_v44  ;;  %v660_v44 = vld [vmem:[%s1915_s3 + $0x38] sm:$0xff] }
 0x10f   : > { %v618_v4 = vadd.f32 %v1320_v0, %v607_v45  ;;  %v697_v19 = vrot.slane %v1801_v63, 1  ;;  %v886_v21 = vrot.slane %v1801_v63, 2  ;;  %v1272_v45 = vpack.c.bf16 %v660_v44, %v659_v43 }
 0x110   : > { %630 = vst.msk [vmem:[#allocation2 + $0x18] sm:$0xff] %vm627_vm3, %v623_v2  ;;  %v619_v5 = vadd.f32 %v1321_v3, %v611_v47  ;;  %v662_v47 = vld [vmem:[%s1915_s3 + $0x48] sm:$0xff] }
 0x111   : > { %v624_v6 = vmax.f32 %v618_v4, 0.0  ;;  %v1275_v48 = vpack.c.bf16 %v662_v47, %v661_v46 }
 0x112   : > { %v625_v8 = vmax.f32 %v619_v5, 0.0 }
 0x113   : > { %631 = vst [vmem:[#allocation2 + $0x20] sm:$0x3] %v624_v6 }
 0x114   : > { %633 = vst.msk [vmem:[#allocation2 + $0x28] sm:$0x3] %vm632_vm5, %v625_v8  ;;  %v1804_v9 = vld [vmem:[#allocation2] sm:$0xff]  ;;  %v648_v10 = vld [vmem:[#allocation2 + $0x8] sm:$0xff] }
 0x115   : > { %645 = vst.msk [vmem:[#allocation2 + $0x21] ss:$8 sm:$0x3] %vm1793_vm4, %v1379_v7  ;;  %v696_v14 = vrot.slane %v1804_v9, 1  ;;  %v885_v15 = vrot.slane %v1804_v9, 2  ;;  %v699_v16 = vrot.slane %v648_v10, 1 }
 0x116   : > { %v888_v18 = vrot.slane %v648_v10, 2 }
 0x117   : > { %v1815_v13 = vld [vmem:[#allocation2 + $0x18] sm:$0xff]  ;;  %v698_v26 = vsel %vm295_vm1, %v696_v14, %v697_v19  ;;  %v887_v27 = vsel %vm501_vm2, %v885_v15, %v886_v21 }
 0x118   : > { %v700_v17 = vrot.slane %v1815_v13, 1  ;;  %v889_v7 = vrot.slane %v1815_v13, 2 }
 0x11a   : > { %v701_v24 = vsel %vm295_vm1, %v699_v16, %v700_v17  ;;  %v890_v25 = vsel %vm501_vm2, %v888_v18, %v889_v7 }
 0x11b   : > { %1147 = vmatprep.mubr.msk.f32.mxu1 %vm627_vm3, %v701_v24  ;;  %1169 = vmatprep.mubr.msk.f32.mxu0 %vm627_vm3, %v890_v25 }
 0x11c   : > { %777 = vmatmul.mubr.f32.vlgmr.msra.gmra.mrb[6].mxu1 %v698_v26  ;;  %966 = vmatmul.mubr.f32.vlgmr.msra.gmra.mrb[6].mxu0 %v887_v27  ;;  %v652_v28 = vld [vmem:[#allocation2 + $0x28] sm:$0x3]  ;;  %v651_v30 = vld [vmem:[#allocation2 + $0x20] sm:$0x3] }
 0x11d   : > { %1264 = vmatpush1.bf16.msra.mxu1 %v1263_v20  ;;  %v704_v32 = vrot.slane %v652_v28, 1  ;;  %v893_v33 = vrot.slane %v652_v28, 2  ;;  %v702_v34 = vrot.slane %v651_v30, 1  ;;  %v891_v35 = vrot.slane %v651_v30, 2 }
 0x11e   : > { %1265 = vmatprep.subr.bf16.mxu1 %v1380_v31 }
 0x11f   : > { %v705_v38 = vsel %vm295_vm1, %v700_v17, %v704_v32  ;;  %v894_v39 = vsel %vm501_vm2, %v889_v7, %v893_v33  ;;  %v703_v40 = vsel %vm295_vm1, %v697_v19, %v702_v34  ;;  %v892_v41 = vsel %vm501_vm2, %v886_v21, %v891_v35 }
 0x120   : > { %1148 = vmatprep.mubr.msk.f32.mxu1 %vm627_vm3, %v705_v38  ;;  %1170 = vmatprep.mubr.msk.f32.mxu0 %vm627_vm3, %v894_v39 }
 0x121   : > { %1267 = vmatpush1.bf16.msra.mxu1 %v1266_v29  ;;  %971 = vmatmul.mubr.f32.gmra.mrb[8].mxu0 %v892_v41 }
 0x122   : > { %782 = vmatmul.mubr.f32.gmra.mrb[8].mxu1 %v703_v40  ;;  %1268 = vmatprep.subr.bf16.mxu1 %v1380_v31 }
 0x123   : > { %1149 = vmatprep.mubr.msk.f32.mxu1 %vm627_vm3, %v648_v10 }
 0x125   : > { %1270 = vmatpush1.bf16.msra.mxu1 %v1269_v42 }
 0x126   : > { %1271 = vmatprep.subr.bf16.mxu1 %v1380_v31 }
 0x129   : > { %1273 = vmatpush1.bf16.msra.mxu1 %v1272_v45 }
 0x12a   : > { %1274 = vmatprep.subr.bf16.mxu1 %v1380_v31 }
 0x12d   : > { %1276 = vmatpush1.bf16.msra.mxu1 %v1275_v48 }
 0x12e   : > { %1277 = vmatprep.subr.bf16.mxu1 %v1380_v31 }
 0x131   : > { %1279 = vmatpush1.bf16.msra.mxu1 %v1278_v51 }
 0x132   : > { %1280 = vmatprep.subr.bf16.mxu1 %v1380_v31 }
 0x135   : > { %1282 = vmatpush1.bf16.msra.mxu1 %v1281_v54 }
 0x136   : > { %1283 = vmatprep.subr.bf16.mxu1 %v1380_v31 }
 0x139   : > { %1285 = vmatpush1.bf16.msra.mxu1 %v1284_v57 }
 0x13a   : > { %1286 = vmatprep.subr.bf16.mxu1 %v1380_v31 }
 0x13d   : > { %1288 = vmatpush1.bf16.msra.mxu1 %v1287_v60 }
 0x140   : > { %856 = vmatmul.mubr.f32.vlgmr.msra.gmra.mrb[10].mxu1 %v1804_v9  ;;  %v1171_v9 = vld [vmem:[%s1916_s4] ss:$0 sm:$0xff] }
 0x141   : > { %1150 = vmatprep.mubr.msk.f32.mxu1 %vm627_vm3, %v1815_v13 }
 0x144   : > { %861 = vmatmul.mubr.f32.gmra.mrb[12].mxu1 %v1801_v63 }
 0x1ef   : > { %v778_v61 = vpop.f32.mrb[6].mxu1  ;;  %v967_v62 = vpop.f32.mrb[6].mxu0 }
 0x1f0   : > { %v780_v0 = vpop.f32.mrb[7].mxu1  ;;  %v969_v1 = vpop.f32.mrb[7].mxu0 }
 0x1f4   : > { %v972_v2 = vpop.f32.mrb[8].mxu0 }
 0x1f5   : > { %v783_v3 = vpop.f32.mrb[8].mxu1  ;;  %v974_v4 = vpop.f32.mrb[9].mxu0 }
 0x1f6   : > { %v785_v5 = vpop.f32.mrb[9].mxu1 }
 0x213   : > { %v857_v6 = vpop.f32.mrb[10].mxu1 }
 0x214   : > { %v858_v8 = vadd.f32 %v857_v6, %v778_v61  ;;  %v859_v31 = vpop.f32.mrb[11].mxu1 }
 0x216   : > { %v976_v10 = vadd.f32 %v967_v62, %v858_v8 }
 0x217   : > { %v862_v11 = vpop.f32.mrb[12].mxu1 }
 0x218   : > { %v985_v12 = vadd.f32 %v1171_v9, %v976_v10  ;;  %v863_v63 = vadd.f32 %v862_v11, %v783_v3  ;;  %v864_v13 = vpop.f32.mrb[13].mxu1 }
 0x21a   : > { %v987_v14 = vmax.f32 %v985_v12, 0.0  ;;  %v977_v15 = vadd.f32 %v972_v2, %v863_v63 }
 0x21c   : > { %989 = vst [vmem:[%s246_s6] sm:$0xff] %v987_v14  ;;  %v986_v16 = vadd.f32 %v1171_v9, %v977_v15 }
 0x21e   : > { %v988_v17 = vmax.f32 %v986_v16, 0.0 }
 0x220   : > { %990 = vst [vmem:[%s246_s6 + $0x8] sm:$0xff] %v988_v17 }
 0x221 PF: > { %s15_s20 = sadd.s32 1, %s1377_s20   ;;  %s1920_s18 = smov %s1373_s19 }
 0x222   : > { %p12_p5 = scmp.ge.s32.totalorder %s15_s20, 4   ;;  %s1921_s19 = smov %s1923_s21 }
 0x224   :  { %14 = sbr.rel (!%p12_p5) target bundleno = 2 (0x2), region = 79 }

</bundles_post_ra>
